<compile_context>
chip_gen: v7x
topology: tpu7x:2x2x1
jax: 0.10.0
libtpu: 0.0.40
codegen_flags: <defaults>
</compile_context>

<pallas_src>
import jax
import jax.numpy as jnp
from jax.experimental import pallas as pl
from jax.experimental.pallas import tpu as pltpu


def _round_up(x, m):
    return (x + m - 1) // m * m


def _pick_tile(total, cap, unit):
    """Largest power-of-two multiple of `unit` that divides `total` and is <= cap."""
    t = unit
    while t * 2 <= cap and total % (t * 2) == 0:
        t *= 2
    return t


# ---------------------------------------------------------------------------
# One-time parameter preparation (init time, NOT on the forward path).
# ---------------------------------------------------------------------------
def prepare_mlc_params(classifier_w, classifier_b, embed_table,
                       param_dtype=jnp.bfloat16):
    """Pad / transpose / cast the MLC parameters once.

    classifier_w : (C, F) float32   (PyTorch nn.Linear layout)
    classifier_b : (C,)   float32
    embed_table  : (C, D) float32
    """
    C, F = classifier_w.shape
    D = embed_table.shape[1]
    C_pad = _round_up(C, 128)     # lane-dense class dim (unmasked stores)
    F_pad = _round_up(F, 128)
    D_pad = _round_up(D, 128)

    # Pre-transposed to (F, C) so the kernel computes x @ W on the MXU.
    w_t = jnp.pad(classifier_w.astype(jnp.float32).T,
                  ((0, F_pad - F), (0, C_pad - C))).astype(param_dtype)
    # Padded class columns get a very negative bias -> exp() underflows to 0,
    # so they never pollute the softmax denominator (and are sliced off anyway).
    b = jnp.pad(classifier_b.astype(jnp.float32).reshape(1, C),
                ((0, 0), (0, C_pad - C)), constant_values=-1e30)
    emb = jnp.pad(embed_table.astype(jnp.float32),
                  ((0, C_pad - C), (0, D_pad - D)))
    return {"w_t": w_t, "b": b, "emb": emb,
            "classes": C, "features": F, "sem_dim": D}


# ---------------------------------------------------------------------------
# Kernel 1: logits = x @ W + b accumulated over F tiles directly into the
# resident f32 output block; numerically-stable softmax fused into the last
# reduction step (exact divide in the epilogue).
# ---------------------------------------------------------------------------
def _classifier_softmax_kernel(x_ref, w_ref, b_ref, tags_ref):
    k = pl.program_id(1)

    @pl.when(k == 0)
    def _():
        tags_ref[...] = jnp.zeros_like(tags_ref)

    # bf16 x bf16 -> f32 accumulation on the MXU, into the resident out block.
    tags_ref[...] += jnp.dot(x_ref[...].astype(w_ref.dtype), w_ref[...],
                             preferred_element_type=jnp.float32)

    @pl.when(k == pl.num_programs(1) - 1)
    def _():
        logits = tags_ref[...] + b_ref[...]            # (TB, Cp) + (1, Cp)
        m = jnp.max(logits, axis=-1, keepdims=True)
        e = jnp.exp(logits - m)
        denom = jnp.sum(e, axis=-1, keepdims=True)
        tags_ref[...] = e / denom                      # exact: epilogue only


def classifier_softmax(x, w_t_p, b_p, classes):
    """softmax(x @ W + b) with pre-padded (F_pad, C_pad) weights."""
    B, F = x.shape
    F_pad, C_pad = w_t_p.shape

    B_pad = _round_up(B, 8)
    # v7x has 2 TensorCores: keep >= 2 steps on the parallel batch axis
    # whenever the batch is large enough to split.
    cap_b = B_pad // 2 if B_pad >= 16 else B_pad
    tile_b = _pick_tile(B_pad, min(256, cap_b), 8)

    tile_f = _pick_tile(F_pad, 512, 128)
    w_bytes = w_t_p.dtype.itemsize
    # Bound the double-buffered W tile (v5e default scoped VMEM is 16 MiB).
    while tile_f > 128 and 2 * tile_f * C_pad * w_bytes > (10 << 20):
        tile_f //= 2

    # Only the activation is padded per call (batch-sized; no-op when aligned).
    if B_pad != B or F_pad != F:
        x = jnp.pad(x, ((0, B_pad - B), (0, F_pad - F)))

    need = 2 * (tile_b * tile_f * 4            # x tile (f32)
                + tile_f * C_pad * w_bytes     # W tile (bf16)
                + 8 * C_pad * 4                # bias row (sublane-padded)
                + tile_b * C_pad * 4)          # resident f32 output block
    vmem_limit = int(min(64 << 20, max(need + (4 << 20), 16 << 20)))

    tags_p = pl.pallas_call(
        _classifier_softmax_kernel,
        out_shape=jax.ShapeDtypeStruct((B_pad, C_pad), jnp.float32),
        grid=(B_pad // tile_b, F_pad // tile_f),
        in_specs=[
            pl.BlockSpec((tile_b, tile_f), lambda i, k: (i, k)),   # x tile
            pl.BlockSpec((tile_f, C_pad), lambda i, k: (k, 0)),    # W tile
            pl.BlockSpec((1, C_pad), lambda i, k: (0, 0)),         # bias row
        ],
        out_specs=pl.BlockSpec((tile_b, C_pad), lambda i, k: (i, 0)),
        compiler_params=pltpu.CompilerParams(
            dimension_semantics=("parallel", "arbitrary"),
            vmem_limit_bytes=vmem_limit),
    )(x, w_t_p, b_p)

    return tags_p[:B, :classes]


# ---------------------------------------------------------------------------
# Kernel 2a (small tables): embedding gather as a one-hot matmul on the MXU.
#   out[n, :] = emb[idx[n], :]  ==  onehot(idx) @ emb   (exact for 0/1 weights)
# ---------------------------------------------------------------------------
_ONEHOT_GATHER_MAX_CPAD = 2048


def _embed_gather_onehot_kernel(idx_ref, emb_ref, out_ref):
    n = out_ref.shape[0]
    c = emb_ref.shape[0]
    class_ids = jax.lax.broadcasted_iota(jnp.int32, (n, c), 1)
    onehot = (class_ids == idx_ref[...]).astype(jnp.float32)      # (n, c)
    out_ref[...] = jnp.dot(onehot, emb_ref[...],
                           preferred_element_type=jnp.float32
                           ).astype(out_ref.dtype)


def _embed_gather_onehot(idx_flat, emb_p):
    N = idx_flat.shape[0]
    C_pad, D_pad = emb_p.shape
    N_pad = _round_up(N, 8)
    cap_n = N_pad // 2 if N_pad >= 16 else N_pad
    tile_n = _pick_tile(N_pad, min(256, cap_n), 8)

    # Padded gather indices resolve to row 0 and are sliced off by the caller.
    idx_p = jnp.pad(idx_flat.astype(jnp.int32), (0, N_pad - N)).reshape(N_pad, 1)

    need = (2 * (tile_n * 128 * 4 + C_pad * D_pad * 4 + tile_n * D_pad * 4)
            + tile_n * C_pad * 4)
    vmem_limit = int(min(64 << 20, max(need + (4 << 20), 16 << 20)))

    return pl.pallas_call(
        _embed_gather_onehot_kernel,
        out_shape=jax.ShapeDtypeStruct((N_pad, D_pad), emb_p.dtype),
        grid=(N_pad // tile_n,),
        in_specs=[
            pl.BlockSpec((tile_n, 1), lambda i: (i, 0)),       # index column
            pl.BlockSpec((C_pad, D_pad), lambda i: (0, 0)),    # full table
        ],
        out_specs=pl.BlockSpec((tile_n, D_pad), lambda i: (i, 0)),
        compiler_params=pltpu.CompilerParams(
            dimension_semantics=("parallel",),
            vmem_limit_bytes=vmem_limit),
    )(idx_p, emb_p)


# ---------------------------------------------------------------------------
# Kernel 2b (large tables): true DMA row gather.  Indices arrive via scalar
# prefetch (SMEM), the table stays in HBM (pl.ANY) and each grid step issues
# tile_n concurrent row DMAs straight into the pipelined output block.
# O(N*D) bytes, zero MXU work, zero table VMEM, bit-exact.
# ---------------------------------------------------------------------------
def _embed_gather_dma_kernel(idx_ref, emb_hbm, out_ref, sem):
    i = pl.program_id(0)
    tile_n = out_ref.shape[0]
    copies = []
    for n in range(tile_n):              # static unroll (tile_n <= 32)
        row = idx_ref[i * tile_n + n]
        cp = pltpu.make_async_copy(emb_hbm.at[row], out_ref.at[n], sem.at[n])
        cp.start()
        copies.append(cp)
    for cp in copies:                    # all rows in flight, then drain
        cp.wait()


def _embed_gather_dma(idx_flat, emb_p):
    N = idx_flat.shape[0]
    _, D_pad = emb_p.shape
    N_pad = _round_up(N, 8)
    tile_n = _pick_tile(N_pad, 32, 8)    # <= 32 in-flight row DMAs per step

    idx_p = jnp.pad(idx_flat.astype(jnp.int32), (0, N_pad - N))

    return pl.pallas_call(
        _embed_gather_dma_kernel,
        out_shape=jax.ShapeDtypeStruct((N_pad, D_pad), emb_p.dtype),
        grid_spec=pltpu.PrefetchScalarGridSpec(
            num_scalar_prefetch=1,
            grid=(N_pad // tile_n,),
            in_specs=[pl.BlockSpec(memory_space=pl.ANY)],   # table stays in HBM
            out_specs=pl.BlockSpec((tile_n, D_pad), lambda i, idx: (i, 0)),
            scratch_shapes=[pltpu.SemaphoreType.DMA((tile_n,))]),
        compiler_params=pltpu.CompilerParams(
            dimension_semantics=("arbitrary",)),
    )(idx_p, emb_p)


def embed_gather(idx_flat, emb_p, sem_dim):
    C_pad, _ = emb_p.shape
    if C_pad <= _ONEHOT_GATHER_MAX_CPAD:
        out = _embed_gather_onehot(idx_flat, emb_p)
    else:
        out = _embed_gather_dma(idx_flat, emb_p)
    return out[:idx_flat.shape[0], :sem_dim]


# ---------------------------------------------------------------------------
# MLC forward: wires the kernels together (top-k stays in JAX glue).
# ---------------------------------------------------------------------------
def mlc_forward(avg_features, params, k):
    B = avg_features.shape[0]
    C, D = params["classes"], params["sem_dim"]

    tags = classifier_softmax(avg_features, params["w_t"], params["b"], C)
    # TODO(synk): torch.topk has no Pallas equivalent; jax.lax.top_k in glue.
    _, top_idx = jax.lax.top_k(tags, k)                     # (B, k)
    idx_flat = top_idx.reshape(B * k).astype(jnp.int32)
    sem_flat = embed_gather(idx_flat, params["emb"], D)     # (B*k, D)
    return tags, sem_flat.reshape(B, k, D)


# ---------------------------------------------------------------------------
# Pure-JAX reference at the same (bf16 weight-stream) precision as the kernel.
# ---------------------------------------------------------------------------
def mlc_reference(avg_features, params, k):
    C, D, F = params["classes"], params["sem_dim"], params["features"]
    w = params["w_t"][:F, :C]
    b = params["b"][0, :C]
    emb = params["emb"][:C, :D]
    logits = jnp.dot(avg_features.astype(w.dtype), w,
                     preferred_element_type=jnp.float32) + b
    tags = jax.nn.softmax(logits, axis=-1)
    _, top_idx = jax.lax.top_k(tags, k)
    return tags, emb[top_idx]


# ---------------------------------------------------------------------------
# Self-test.
# ---------------------------------------------------------------------------
def _run_case(key, B, F, C, D, K):
    k_x, k_w, k_e = jax.random.split(key, 3)
    avg_features = jax.random.normal(k_x, (B, F), dtype=jnp.float32)
    # classifier.weight ~ U(-0.1, 0.1), bias = 0  (per MLC.__init_weight)
    classifier_w = jax.random.uniform(k_w, (C, F), minval=-0.1, maxval=0.1,
                                      dtype=jnp.float32)
    classifier_b = jnp.zeros((C,), dtype=jnp.float32)
    # nn.Embedding default init ~ N(0, 1)
    embed_table = jax.random.normal(k_e, (C, D), dtype=jnp.float32)

    params = prepare_mlc_params(classifier_w, classifier_b, embed_table)

    tags, sem = mlc_forward(avg_features, params, K)
    jax.block_until_ready((tags, sem))

    tags_ref, sem_ref = mlc_reference(avg_features, params, K)

    assert tags.shape == (B, C) and sem.shape == (B, K, D)
    assert jnp.allclose(tags, tags_ref, atol=1e-5, rtol=1e-4), \
        float(jnp.max(jnp.abs(tags - tags_ref)))
    assert jnp.allclose(sem, sem_ref, atol=1e-5, rtol=1e-5), \
        float(jnp.max(jnp.abs(sem - sem_ref)))


if __name__ == "__main__":
    key = jax.random.PRNGKey(0)
    k1, k2 = jax.random.split(key)

    # Small demo shapes: single F tile, one-hot MXU gather path.
    _run_case(k1, B=8, F=256, C=64, D=64, K=10)
    # Larger shapes: multi-tile F reduction (bf16 weight streaming) + DMA
    # row-gather path (C_pad > 2048).
    _run_case(k2, B=4, F=2048, C=2500, D=512, K=10)

    print("KERNEL_OK")
</pallas_src>

<mosaic_0001>
module attributes {stable_mosaic.version = 11 : i64} {
  func.func @_classifier_softmax_kernel(%arg0: i32, %arg1: i32, %arg2: memref<8x256xf32, #tpu.memory_space<vmem>>, %arg3: memref<256x128xbf16, #tpu.memory_space<vmem>>, %arg4: memref<1x128xf32, #tpu.memory_space<vmem>>, %arg5: memref<8x128xf32, #tpu.memory_space<vmem>>) attributes {dimension_semantics = [#tpu.dimension_semantics<parallel>, #tpu.dimension_semantics<arbitrary>], iteration_bounds = array<i64: 1, 1>, scalar_prefetch = 0 : i64, scratch_operands = 0 : i64, tpu.core_type = #tpu.core_type<tc>, window_params = [{transform_indices = @transform_0, window_bounds = array<i64: 8, 256>}, {transform_indices = @transform_1, window_bounds = array<i64: 256, 128>}, {pipeline_mode = #tpu.pipeline_mode<synchronous>, transform_indices = @transform_2, window_bounds = array<i64: 1, 128>}, {transform_indices = @transform_3, window_bounds = array<i64: 8, 128>}]} {
    %c0_i32 = arith.constant 0 : i32
    %0 = arith.cmpi eq, %arg1, %c0_i32 : i32
    %1 = arith.extui %0 : i1 to i32
    %c0_i32_0 = arith.constant 0 : i32
    %2 = arith.cmpi ne, %1, %c0_i32_0 : i32
    scf.if %2 {
      %cst_10 = arith.constant 0.000000e+00 : f32
      %13 = vector.broadcast %cst_10 : f32 to vector<8x128xf32>
      %c0_11 = arith.constant 0 : index
      %c0_12 = arith.constant 0 : index
      %14 = vector.load %arg5[%c0_11, %c0_12] : memref<8x128xf32, #tpu.memory_space<vmem>>, vector<8x128xf32>
      tpu.vector_store %arg5[%c0_11, %c0_12], %13 {strides = array<i32>} : memref<8x128xf32, #tpu.memory_space<vmem>>, vector<8x128xf32>,
    } else {
    }
    %c0 = arith.constant 0 : index
    %c0_1 = arith.constant 0 : index
    %3 = vector.load %arg5[%c0, %c0_1] : memref<8x128xf32, #tpu.memory_space<vmem>>, vector<8x128xf32>
    %c0_2 = arith.constant 0 : index
    %c0_3 = arith.constant 0 : index
    %4 = vector.load %arg2[%c0_2, %c0_3] : memref<8x256xf32, #tpu.memory_space<vmem>>, vector<8x256xf32>
    %5 = arith.truncf %4 : vector<8x256xf32> to vector<8x256xbf16>
    %c0_4 = arith.constant 0 : index
    %c0_5 = arith.constant 0 : index
    %6 = vector.load %arg3[%c0_4, %c0_5] : memref<256x128xbf16, #tpu.memory_space<vmem>>, vector<256x128xbf16>
    %cst = arith.constant dense<0.000000e+00> : vector<8x128xf32>
    %7 = tpu.matmul %5, %6, %cst {dimension_numbers = #tpu.dot_dimension_numbers<[1], [0], [0], [1], [0, 0, 1, 1], [], []>} : vector<8x256xbf16>, vector<256x128xbf16>, vector<8x128xf32> -> vector<8x128xf32>
    %8 = arith.addf %3, %7 : vector<8x128xf32>
    %c0_6 = arith.constant 0 : index
    %c0_7 = arith.constant 0 : index
    %9 = vector.load %arg5[%c0_6, %c0_7] : memref<8x128xf32, #tpu.memory_space<vmem>>, vector<8x128xf32>
    tpu.vector_store %arg5[%c0_6, %c0_7], %8 {strides = array<i32>} : memref<8x128xf32, #tpu.memory_space<vmem>>, vector<8x128xf32>,
    %c0_i32_8 = arith.constant 0 : i32
    %10 = arith.cmpi eq, %arg1, %c0_i32_8 : i32
    %11 = arith.extui %10 : i1 to i32
    %c0_i32_9 = arith.constant 0 : i32
    %12 = arith.cmpi ne, %11, %c0_i32_9 : i32
    scf.if %12 {
      %c0_10 = arith.constant 0 : index
      %c0_11 = arith.constant 0 : index
      %13 = vector.load %arg5[%c0_10, %c0_11] : memref<8x128xf32, #tpu.memory_space<vmem>>, vector<8x128xf32>
      %c0_12 = arith.constant 0 : index
      %c0_13 = arith.constant 0 : index
      %14 = vector.load %arg4[%c0_12, %c0_13] : memref<1x128xf32, #tpu.memory_space<vmem>>, vector<1x128xf32>
      %15 = vector.broadcast %14 : vector<1x128xf32> to vector<8x128xf32>
      %16 = arith.addf %13, %15 : vector<8x128xf32>
      %cst_14 = arith.constant dense<0xFF800000> : vector<8xf32>
      %17 = vector.multi_reduction <maximumf>, %16, %cst_14 [1] : vector<8x128xf32> to vector<8xf32>
      %18 = vector.shape_cast %17 : vector<8xf32> to vector<8x1xf32>
      %19 = vector.broadcast %18 : vector<8x1xf32> to vector<8x128xf32>
      %20 = arith.subf %16, %19 : vector<8x128xf32>
      %21 = math.exp %20 : vector<8x128xf32>
      %cst_15 = arith.constant dense<0.000000e+00> : vector<8xf32>
      %22 = vector.multi_reduction <add>, %21, %cst_15 [1] : vector<8x128xf32> to vector<8xf32>
      %23 = vector.shape_cast %22 : vector<8xf32> to vector<8x1xf32>
      %24 = vector.broadcast %23 : vector<8x1xf32> to vector<8x128xf32>
      %25 = arith.divf %21, %24 : vector<8x128xf32>
      %c0_16 = arith.constant 0 : index
      %c0_17 = arith.constant 0 : index
      %26 = vector.load %arg5[%c0_16, %c0_17] : memref<8x128xf32, #tpu.memory_space<vmem>>, vector<8x128xf32>
      tpu.vector_store %arg5[%c0_16, %c0_17], %25 {strides = array<i32>} : memref<8x128xf32, #tpu.memory_space<vmem>>, vector<8x128xf32>,
    } else {
    }
    return
  }
  func.func @transform_0(%arg0: i32, %arg1: i32) -> (i32, i32) {
    %c0_i32 = arith.constant 0 : i32
    return %arg0, %arg1 : i32, i32
  }
  func.func @transform_1(%arg0: i32, %arg1: i32) -> (i32, i32) {
    %c0_i32 = arith.constant 0 : i32
    %c0_i32_0 = arith.constant 0 : i32
    return %arg1, %c0_i32 : i32, i32
  }
  func.func @transform_2(%arg0: i32, %arg1: i32) -> (i32, i32) {
    %c0_i32 = arith.constant 0 : i32
    %c0_i32_0 = arith.constant 0 : i32
    %c0_i32_1 = arith.constant 0 : i32
    return %c0_i32, %c0_i32_0 : i32, i32
  }
  func.func @transform_3(%arg0: i32, %arg1: i32) -> (i32, i32) {
    %c0_i32 = arith.constant 0 : i32
    %c0_i32_0 = arith.constant 0 : i32
    return %arg0, %c0_i32 : i32, i32
  }
}

</mosaic_0001>

<bundles_post_ra>
// kernel: tpu_custom_call.1
= control target key start
LH: loop header
LB: loop body
LE: loop exit
PB: predicated region body
PF: predicated region fallthrough
CT: control target
= control target key end

     0   :  { %8 = vsyncpa [#allocation3], 0  ;;  %s468_s0 = inlined_call_operand.hbm [shape: f32[8,256], index: 0, kind: input, shape index: {}]   ;;  %s469_s1 = inlined_call_operand.hbm [shape: bf16[256,128], index: 1, kind: input, shape index: {}]   ;;  %s470_s2 = inlined_call_operand.vmem [shape: f32[1,128], index: 2, kind: input, shape index: {}]   ;;  %s471_s3 = inlined_call_operand.hbm [shape: f32[8,128], index: 3, kind: output, shape index: {}]  }
   0x1   :  { %9 = vsyncpa [#allocation6], 0 }
   0x2   :  { %10 = vsyncpa [#allocation4], 0  ;;  %s397_s12 = smov [#allocation2]   ;;  %s398_s14 = smov [#allocation5]  }
   0x3   :  { %s17_s13 = sshll.u32 %s397_s12, 4  ;;  %s26_s15 = sshll.u32 %s398_s14, 4  ;;  %s18_s13 = int_to_ptr.vmem [resolvable:$true] %s17_s13  ;;  %s422_s15 = int_to_ptr.vmem [resolvable:$true] %s26_s15 }
   0x4   :  { %s325_s18 = scalar_lea.hbm %s468_s0, 256 }
   0x5   :  { %p326_p0 = scmp.ne.s32.totalorder %s468_s0, %s325_s18  ;;  %p329_p1 = scmp.lt.u32.totalorder %s325_s18, %s468_s0 }
   0x7   :  { %p331_p2 = pnand %p329_p1, %p326_p0 }
   0x9   :  { %334 = shalt.err (!%p331_p2)
}
   0xa   :  { %s335_s23 = scalar_lea.vmem %s18_s13, 256  ;;  %p340_p4 = scmp.lt.s32.totalorder %s18_s13, %s18_s13 }
   0xb   :  { %p336_p3 = scmp.ne.s32.totalorder %s18_s13, %s335_s23  ;;  %p341_p5 = scmp.lt.s32.totalorder %s335_s23, %s335_s23 }
   0xd   :  { %p342_p6 = por %p341_p5, %p340_p4 }
   0xf   :  { %p343_p7 = pnand %p342_p6, %p336_p3 }
  0x11   :  { %346 = shalt.err (!%p343_p7)
}
  0x12   :  { %20 = dma.hbm_to_vmem [thread:$0]  %s468_s0, 256, %s18_s13, [#allocation3]  }
  0x13   :  { %s347_s28 = scalar_lea.hbm %s469_s1, 2048 }
  0x14   :  { %p348_p8 = scmp.ne.s32.totalorder %s469_s1, %s347_s28  ;;  %p351_p9 = scmp.lt.u32.totalorder %s347_s28, %s469_s1 }
  0x16   :  { %p353_p10 = pnand %p351_p9, %p348_p8 }
  0x18   :  { %356 = shalt.err (!%p353_p10)
}
  0x19   :  { %s357_s6 = scalar_lea.vmem %s422_s15, 2048  ;;  %p362_p12 = scmp.lt.s32.totalorder %s422_s15, %s422_s15 }
  0x1a   :  { %p358_p11 = scmp.ne.s32.totalorder %s422_s15, %s357_s6  ;;  %p363_p13 = scmp.lt.s32.totalorder %s357_s6, %s357_s6 }
  0x1c   :  { %p364_p0 = por %p363_p13, %p362_p12 }
  0x1e   :  { %p365_p1 = pnand %p364_p0, %p358_p11 }
  0x20   :  { %368 = shalt.err (!%p365_p1)
}
  0x21   :  { %s399_s0 = smov 64   ;;  %s400_s7 = smov 4  }
  0x22   :  { %32 = dma.hbm_to_vmem [thread:$0]  %s469_s1, 2048, %s422_s15, [#allocation6], %s399_s0, %s399_s0, %s400_s7  }
  0x23   :  { %391 = dma.done.wait [#allocation3], 256  }
  0x24   :  { %392 = vsyncadd [#allocation3], 4294967040 }
  0x25   :  { %393 = dma.done.wait [#allocation6], 2048  }
  0x26   :  { %394 = vsyncadd [#allocation6], 4294965248  ;;  %v305_v0 = vld [vmem:[#allocation5 + $0x40] sm:$0xff]   ;;  %v307_v2 = vld [vmem:[#allocation5 + $0x48] sm:$0xff]   ;;  %s401_s11 = smov [#allocation7]  }
  0x27   :  { %v306_v1 = vld [vmem:[#allocation5] sm:$0xff]   ;;  %277 = vmatprep.subr.bf16.mxu0 %v305_v0  ;;  %v308_v3 = vld [vmem:[#allocation5 + $0x8] sm:$0xff]   ;;  %v309_v4 = vld [vmem:[#allocation5 + $0x50] sm:$0xff]   ;;  %s250_s12 = sshll.u32 %s401_s11, 4  ;;  %s251_s12 = int_to_ptr.vmem [resolvable:$true] %s250_s12 }
  0x28   :  { %278 = vmatpush3.bf16.msra.mxu0 %v306_v1  ;;  %v310_v5 = vld [vmem:[#allocation5 + $0x10] sm:$0xff]   ;;  %v311_v6 = vld [vmem:[#allocation5 + $0x58] sm:$0xff]   ;;  %v313_v8 = vld [vmem:[#allocation5 + $0x60] sm:$0xff]   ;;  %s369_s13 = scalar_lea.vmem %s251_s12, 128  ;;  %p374_p3 = scmp.lt.s32.totalorder %s251_s12, %s251_s12 }
  0x29   :  { %279 = vmatprep.subr.bf16.mxu0 %v307_v2  ;;  %v312_v7 = vld [vmem:[#allocation5 + $0x18] sm:$0xff]   ;;  %v314_v9 = vld [vmem:[#allocation5 + $0x20] sm:$0xff]   ;;  %v315_v10 = vld [vmem:[#allocation5 + $0x68] sm:$0xff]   ;;  %p370_p2 = scmp.ne.s32.totalorder %s251_s12, %s369_s13  ;;  %p375_p4 = scmp.lt.s32.totalorder %s369_s13, %s369_s13 }
  0x2a   :  { %v49_v11 = vld [vmem:[#allocation2 + $0x8] sm:$0xff]  ;;  %v316_v13 = vld [vmem:[#allocation5 + $0x28] sm:$0xff]   ;;  %v317_v14 = vld [vmem:[#allocation5 + $0x70] sm:$0xff]  }
  0x2b   :  { %v51_v12 = vpack.c.bf16 %v49_v11, %v49_v11  ;;  %v318_v15 = vld [vmem:[#allocation5 + $0x30] sm:$0xff]   ;;  %v319_v16 = vld [vmem:[#allocation5 + $0x78] sm:$0xff]   ;;  %p376_p5 = por %p375_p4, %p374_p3 }
  0x2c   :  { %280 = vmatpush3.bf16.msra.mxu0 %v308_v3  ;;  %v320_v17 = vld [vmem:[#allocation5 + $0x38] sm:$0xff]   ;;  %v48_v18 = vld [vmem:[#allocation2] sm:$0xff] }
  0x2d   :  { %281 = vmatprep.subr.bf16.mxu0 %v309_v4  ;;  %212 = vmatprep.mubr.bf16.mxu0 %v51_v12  ;;  %v50_v19 = vpack.c.bf16 %v48_v18, %v48_v18  ;;  %v276_v25 = vld [vmem:[%s470_s2] ss:$0 sm:$0xff]  ;;  %p377_p6 = pnand %p376_p5, %p370_p2 }
  0x30   :  { %282 = vmatpush3.bf16.msra.mxu0 %v310_v5 }
  0x31   :  { %283 = vmatprep.subr.bf16.mxu0 %v311_v6 }
  0x34   :  { %284 = vmatpush3.bf16.msra.mxu0 %v312_v7 }
  0x35   :  { %285 = vmatprep.subr.bf16.mxu0 %v313_v8 }
  0x38   :  { %286 = vmatpush3.bf16.msra.mxu0 %v314_v9 }
  0x39   :  { %287 = vmatprep.subr.bf16.mxu0 %v315_v10 }
  0x3c   :  { %288 = vmatpush3.bf16.msra.mxu0 %v316_v13 }
  0x3d   :  { %289 = vmatprep.subr.bf16.mxu0 %v317_v14 }
  0x40   :  { %290 = vmatpush3.bf16.msra.mxu0 %v318_v15 }
  0x41   :  { %291 = vmatprep.subr.bf16.mxu0 %v319_v16 }
  0x44   :  { %292 = vmatpush3.bf16.msra.mxu0 %v320_v17 }
  0x47   :  { %213 = vmatmul.mubr.bf16.vlgmr.msra.gmra.mrb[0].mxu0 %v50_v19 }
 0x11a   :  { %v293_v20 = vpop.f32.mrb[0].mxu0 }
 0x11b   :  { %v294_v21 = vpop.f32.mrb[1].mxu0 }
 0x11c   :  { %v295_v22 = vadd.f32 %v294_v21, %v293_v20  ;;  %v296_v23 = vpop.f32.mrb[2].mxu0 }
 0x11d   :  { %v297_v24 = vpop.f32.mrb[3].mxu0 }
 0x11e   :  { %v233_v26 = vadd.f32 %v295_v22, %v276_v25 }
 0x120   :  { %234 = vmax.xlane.f32.xlu0 %v233_v26 }
 0x1ad   :  { %v235_v27 = vpop.xlane.xlu0 %234 }
 0x1ae   :  { %v236_v28 = vsub.f32 %v233_v26, %v235_v27 }
 0x1b0   :  { %v237_v29 = vmul.f32 1.442695, %v236_v28 }
 0x1b2   :  { %321 = vpow2.f32 %v237_v29 }
 0x1bc   :  { %v322_v30 = vpop.eup %321 }
 0x1bd   :  { %239 = vadd.xlane.f32.xlu0 %v322_v30 }
 0x24a   :  { %v240_v31 = vpop.xlane.xlu0 %239 }
 0x24b   :  { %323 = vrcp.f32 %v240_v31 }
 0x255   :  { %v324_v32 = vpop.eup %323 }
 0x256   :  { %v242_v33 = vmul.f32 %v324_v32, %v322_v30 }
 0x258   :  { %243 = vst [vmem:[#allocation7] sm:$0xff] %v242_v33 }
 0x259   :  { %380 = shalt.err (!%p377_p6)
}
 0x25a   :  { %s381_s15 = scalar_lea.hbm %s471_s3, 128 }
 0x25b   :  { %p382_p7 = scmp.ne.s32.totalorder %s471_s3, %s381_s15  ;;  %p385_p8 = scmp.lt.u32.totalorder %s381_s15, %s471_s3 }
 0x25d   :  { %p387_p9 = pnand %p385_p8, %p382_p7 }
 0x25f   :  { %390 = shalt.err (!%p387_p9)
}
 0x260   :  { %253 = dma.vmem_to_hbm [thread:$0]  %s251_s12, 128, %s471_s3, [#allocation4]  }
 0x261   :  { %395 = dma.done.wait [#allocation4], 128  }
 0x262   :  { %396 = vsyncadd [#allocation4], 4294967168 }
 0x263   :  { %257 = vsyncpa [#allocation3], 1 }
 0x264   :  { %258 = vsyncpa [#allocation6], 1 }
 0x265   :  { %259 = vsyncpa [#allocation4], 1 }

</bundles_post_ra>
